<compile_context>
chip_gen: v5e
topology: v5e:2x2
jax: 0.10.0
libtpu: 0.0.40
codegen_flags: <defaults>
</compile_context>

<pallas_src>
import jax
import jax.numpy as jnp
from jax.experimental import pallas as pl
from jax.experimental.pallas import tpu as pltpu


def _round_up(x, m):
    return (x + m - 1) // m * m


def hnn_kernel(xT_ref, w1t_ref, b1_ref, w2t_ref, b2_ref, w3_ref, b3_ref, o_ref):
    """Batch-in-lanes fused HNN forward.

    xT_ref : (in_dim, Bt) compute dtype (f32, or bf16 on v6e/v7x)
    w1t_ref: (H, in_dim)  compute dtype      b1_ref: (H, 1) compute dtype
    w2t_ref: (H, H)       compute dtype      b2_ref: (H, 1) compute dtype
    w3_ref : (H, 1)       f32                b3_ref: (1, 1) f32
    o_ref  : (1, Bt)      f32  (lane-dense output row)
    """
    xT = xT_ref[...]
    w1t = w1t_ref[...]
    compute_dtype = xT.dtype

    # ---- Layer 1: K = in_dim (tiny) -> VPU broadcast-FMAs, skip the MXU. ----
    h1_pre = b1_ref[...]                               # (H, 1), broadcasts up
    for k in range(xT.shape[0]):                       # static; in_dim is small
        h1_pre = h1_pre + w1t[:, k:k + 1] * xT[k:k + 1, :]
    h1 = jnp.tanh(h1_pre)                              # (H, Bt) on the EUP

    # ---- Layer 2: (H,H) @ (H,Bt) on the MXU, N = Bt full lanes, f32 acc. ----
    h2_pre = jnp.dot(w2t_ref[...], h1, preferred_element_type=jnp.float32)
    h2 = jnp.tanh(h2_pre.astype(compute_dtype) + b2_ref[...])     # (H, Bt)

    # ---- Layer 3: N = 1 -> f32 multiply + sublane (XLU) reduce. -------------
    out = jnp.sum(h2.astype(jnp.float32) * w3_ref[...], axis=0, keepdims=True)
    o_ref[...] = (out + b3_ref[...]).astype(o_ref.dtype)          # (1, Bt)


def hnn_forward(x, params, *, block_b=512, use_bf16=False):
    """x: (B, input_dim) f32 -> (B, 1) f32.

    use_bf16=True runs the MXU operands AND the activations/tanh in bf16
    (recommended on v6e/v7x); keep False on v5e or when exactness matters.
    block_b caps the per-step lane tile; sweep 256/512/1024/2048 for large B.
    """
    w1, b1, w2, b2, w3, b3 = params
    B, in_dim = x.shape
    H = w1.shape[1]

    # --- Batch tiling: lanes hold the batch, so pad B to a multiple of 128. --
    b_pad = _round_up(B, 128)
    lane_blocks = b_pad // 128
    max_bt_blocks = max(block_b // 128, 1)
    if lane_blocks <= 1:
        bt_blocks = 1
    else:
        # Largest tile that (a) fits block_b, (b) leaves >= 2 grid steps so the
        # "parallel" axis can use both v7x TensorCores, (c) divides the padded
        # batch exactly (no tail-padding waste).
        bt_blocks = max(
            d for d in range(1, min(max_bt_blocks, lane_blocks // 2) + 1)
            if lane_blocks % d == 0)
    bt = bt_blocks * 128
    n_tiles = b_pad // bt

    if b_pad != B:
        x = jnp.pad(x, ((0, b_pad - B), (0, 0)))

    # --- Batch-in-lanes relayout + per-layer weight prep (cheap, wrapper-side).
    xT = x.T                                  # (in_dim, b_pad): dense lane rows
    w1t = w1.T                                # (H, in_dim)
    b1c = b1.reshape(H, 1)
    w2t = w2.T                                # (H, H)
    b2c = b2.reshape(H, 1)
    w3c = w3.reshape(H, 1)                    # stays f32 (final reduce is f32)
    b3c = b3.reshape(1, 1)

    if use_bf16:
        cd = jnp.bfloat16
        xT, w1t, b1c, w2t, b2c = [a.astype(cd) for a in (xT, w1t, b1c, w2t, b2c)]

    # Weights/biases: full-array blocks, constant block index -> VMEM-resident,
    # DMA'd once across all grid steps.
    def resident(arr):
        return pl.BlockSpec(arr.shape, lambda i: (0, 0))

    out = pl.pallas_call(
        hnn_kernel,
        out_shape=jax.ShapeDtypeStruct((1, b_pad), jnp.float32),
        grid=(n_tiles,),
        in_specs=[
            pl.BlockSpec((in_dim, bt), lambda i: (0, i)),   # x^T tiled over lanes
            resident(w1t), resident(b1c),
            resident(w2t), resident(b2c),
            resident(w3c), resident(b3c),
        ],
        out_specs=pl.BlockSpec((1, bt), lambda i: (0, i)),  # lane-dense output row
        compiler_params=pltpu.CompilerParams(
            dimension_semantics=("parallel",)),             # megacore on v7x
    )(xT, w1t, b1c, w2t, b2c, w3c, b3c)

    return out.reshape(b_pad, 1)[:B]


def init_params(key, input_dim=2, hidden_dim=64):
    """Deterministic init mimicking PyTorch nn.Linear default U(-1/sqrt(fan_in), +)."""
    ks = jax.random.split(key, 6)

    def lin(kw, kb, fan_in, fan_out):
        bound = 1.0 / jnp.sqrt(jnp.float32(fan_in))
        w = jax.random.uniform(kw, (fan_in, fan_out), jnp.float32, -bound, bound)
        b = jax.random.uniform(kb, (1, fan_out), jnp.float32, -bound, bound)
        return w, b

    w1, b1 = lin(ks[0], ks[1], input_dim, hidden_dim)
    w2, b2 = lin(ks[2], ks[3], hidden_dim, hidden_dim)
    w3, b3 = lin(ks[4], ks[5], hidden_dim, 1)
    return (w1, b1, w2, b2, w3, b3)


def hnn_reference(x, params):
    w1, b1, w2, b2, w3, b3 = params
    h1 = jnp.tanh(x @ w1 + b1)
    h2 = jnp.tanh(h1 @ w2 + b2)
    return h2 @ w3 + b3


if __name__ == "__main__":
    key = jax.random.PRNGKey(0)
    k_param, k_x, k_x2 = jax.random.split(key, 3)

    input_dim, hidden_dim, batch = 2, 64, 8
    params = init_params(k_param, input_dim, hidden_dim)
    x = jax.random.normal(k_x, (batch, input_dim), jnp.float32)

    # f32 path: exact match to the reference (single 128-lane tile).
    out = jax.block_until_ready(hnn_forward(x, params))
    ref = hnn_reference(x, params)
    assert out.shape == (batch, 1)
    assert jnp.allclose(out, ref, atol=1e-5, rtol=1e-5)

    # bf16 path (v6e/v7x): bf16 MXU operands + bf16 activations/tanh, f32 reduce.
    out_bf16 = jax.block_until_ready(hnn_forward(x, params, use_bf16=True))
    assert jnp.allclose(out_bf16, ref, atol=3e-2, rtol=3e-2)

    # Larger batch: pads 300 -> 384 lanes, 3 grid steps of 128 lanes each
    # (>= 2 steps so v7x megacore engages; no tail waste beyond the 128 round-up).
    big_batch = 300
    xb = jax.random.normal(k_x2, (big_batch, input_dim), jnp.float32)
    out_b = jax.block_until_ready(hnn_forward(xb, params, block_b=512))
    ref_b = hnn_reference(xb, params)
    assert out_b.shape == (big_batch, 1)
    assert jnp.allclose(out_b, ref_b, atol=1e-4, rtol=1e-4)

    print("KERNEL_OK")
</pallas_src>

<mosaic_0001>
module attributes {stable_mosaic.version = 11 : i64} {
  func.func @hnn_kernel(%arg0: i32, %arg1: memref<2x128xf32, #tpu.memory_space<vmem>>, %arg2: memref<64x2xf32, #tpu.memory_space<vmem>>, %arg3: memref<64x1xf32, #tpu.memory_space<vmem>>, %arg4: memref<64x64xf32, #tpu.memory_space<vmem>>, %arg5: memref<64x1xf32, #tpu.memory_space<vmem>>, %arg6: memref<64x1xf32, #tpu.memory_space<vmem>>, %arg7: memref<1x1xf32, #tpu.memory_space<vmem>>, %arg8: memref<1x128xf32, #tpu.memory_space<vmem>>) attributes {dimension_semantics = [#tpu.dimension_semantics<parallel>], iteration_bounds = array<i64: 1>, scalar_prefetch = 0 : i64, scratch_operands = 0 : i64, tpu.core_type = #tpu.core_type<tc>, window_params = [{transform_indices = @transform_0, window_bounds = array<i64: 2, 128>}, {pipeline_mode = #tpu.pipeline_mode<synchronous>, transform_indices = @transform_1, window_bounds = array<i64: 64, 2>}, {pipeline_mode = #tpu.pipeline_mode<synchronous>, transform_indices = @transform_2, window_bounds = array<i64: 64, 1>}, {pipeline_mode = #tpu.pipeline_mode<synchronous>, transform_indices = @transform_3, window_bounds = array<i64: 64, 64>}, {pipeline_mode = #tpu.pipeline_mode<synchronous>, transform_indices = @transform_4, window_bounds = array<i64: 64, 1>}, {pipeline_mode = #tpu.pipeline_mode<synchronous>, transform_indices = @transform_5, window_bounds = array<i64: 64, 1>}, {pipeline_mode = #tpu.pipeline_mode<synchronous>, transform_indices = @transform_6, window_bounds = array<i64: 1, 1>}, {transform_indices = @transform_7, window_bounds = array<i64: 1, 128>}]} {
    %c0 = arith.constant 0 : index
    %c0_0 = arith.constant 0 : index
    %0 = vector.load %arg1[%c0, %c0_0] : memref<2x128xf32, #tpu.memory_space<vmem>>, vector<2x128xf32>
    %c0_1 = arith.constant 0 : index
    %c0_2 = arith.constant 0 : index
    %1 = vector.load %arg2[%c0_1, %c0_2] : memref<64x2xf32, #tpu.memory_space<vmem>>, vector<64x2xf32>
    %c0_3 = arith.constant 0 : index
    %c0_4 = arith.constant 0 : index
    %2 = vector.load %arg3[%c0_3, %c0_4] : memref<64x1xf32, #tpu.memory_space<vmem>>, vector<64x1xf32>
    %3 = vector.extract_strided_slice %1 {offsets = [0, 0], sizes = [64, 1], strides = [1, 1]} : vector<64x2xf32> to vector<64x1xf32>
    %4 = vector.extract_strided_slice %0 {offsets = [0, 0], sizes = [1, 128], strides = [1, 1]} : vector<2x128xf32> to vector<1x128xf32>
    %5 = vector.broadcast %3 : vector<64x1xf32> to vector<64x128xf32>
    %6 = vector.broadcast %4 : vector<1x128xf32> to vector<64x128xf32>
    %7 = arith.mulf %5, %6 : vector<64x128xf32>
    %8 = vector.broadcast %2 : vector<64x1xf32> to vector<64x128xf32>
    %9 = arith.addf %8, %7 : vector<64x128xf32>
    %10 = vector.extract_strided_slice %1 {offsets = [0, 1], sizes = [64, 1], strides = [1, 1]} : vector<64x2xf32> to vector<64x1xf32>
    %11 = vector.extract_strided_slice %0 {offsets = [1, 0], sizes = [1, 128], strides = [1, 1]} : vector<2x128xf32> to vector<1x128xf32>
    %12 = vector.broadcast %10 : vector<64x1xf32> to vector<64x128xf32>
    %13 = vector.broadcast %11 : vector<1x128xf32> to vector<64x128xf32>
    %14 = arith.mulf %12, %13 : vector<64x128xf32>
    %15 = arith.addf %9, %14 : vector<64x128xf32>
    %16 = math.tanh %15 : vector<64x128xf32>
    %c0_5 = arith.constant 0 : index
    %c0_6 = arith.constant 0 : index
    %17 = vector.load %arg4[%c0_5, %c0_6] : memref<64x64xf32, #tpu.memory_space<vmem>>, vector<64x64xf32>
    %cst = arith.constant dense<0.000000e+00> : vector<64x128xf32>
    %18 = tpu.matmul %17, %16, %cst {dimension_numbers = #tpu.dot_dimension_numbers<[1], [0], [0], [1], [0, 0, 1, 1], [], []>} : vector<64x64xf32>, vector<64x128xf32>, vector<64x128xf32> -> vector<64x128xf32>
    %c0_7 = arith.constant 0 : index
    %c0_8 = arith.constant 0 : index
    %19 = vector.load %arg5[%c0_7, %c0_8] : memref<64x1xf32, #tpu.memory_space<vmem>>, vector<64x1xf32>
    %20 = vector.broadcast %19 : vector<64x1xf32> to vector<64x128xf32>
    %21 = arith.addf %18, %20 : vector<64x128xf32>
    %22 = math.tanh %21 : vector<64x128xf32>
    %c0_9 = arith.constant 0 : index
    %c0_10 = arith.constant 0 : index
    %23 = vector.load %arg6[%c0_9, %c0_10] : memref<64x1xf32, #tpu.memory_space<vmem>>, vector<64x1xf32>
    %24 = vector.broadcast %23 : vector<64x1xf32> to vector<64x128xf32>
    %25 = arith.mulf %22, %24 : vector<64x128xf32>
    %cst_11 = arith.constant dense<0.000000e+00> : vector<128xf32>
    %26 = vector.multi_reduction <add>, %25, %cst_11 [0] : vector<64x128xf32> to vector<128xf32>
    %27 = vector.shape_cast %26 : vector<128xf32> to vector<1x128xf32>
    %c0_12 = arith.constant 0 : index
    %c0_13 = arith.constant 0 : index
    %28 = vector.load %arg7[%c0_12, %c0_13] : memref<1x1xf32, #tpu.memory_space<vmem>>, vector<1x1xf32>
    %29 = vector.broadcast %28 : vector<1x1xf32> to vector<1x128xf32>
    %30 = arith.addf %27, %29 : vector<1x128xf32>
    %c0_14 = arith.constant 0 : index
    %c0_15 = arith.constant 0 : index
    %31 = vector.load %arg8[%c0_14, %c0_15] : memref<1x128xf32, #tpu.memory_space<vmem>>, vector<1x128xf32>
    tpu.vector_store %arg8[%c0_14, %c0_15], %30 {strides = array<i32>} : memref<1x128xf32, #tpu.memory_space<vmem>>, vector<1x128xf32>,
    return
  }
  func.func @transform_0(%arg0: i32) -> (i32, i32) {
    %c0_i32 = arith.constant 0 : i32
    %c0_i32_0 = arith.constant 0 : i32
    return %c0_i32, %arg0 : i32, i32
  }
  func.func @transform_1(%arg0: i32) -> (i32, i32) {
    %c0_i32 = arith.constant 0 : i32
    %c0_i32_0 = arith.constant 0 : i32
    %c0_i32_1 = arith.constant 0 : i32
    return %c0_i32, %c0_i32_0 : i32, i32
  }
  func.func @transform_2(%arg0: i32) -> (i32, i32) {
    %c0_i32 = arith.constant 0 : i32
    %c0_i32_0 = arith.constant 0 : i32
    %c0_i32_1 = arith.constant 0 : i32
    return %c0_i32, %c0_i32_0 : i32, i32
  }
  func.func @transform_3(%arg0: i32) -> (i32, i32) {
    %c0_i32 = arith.constant 0 : i32
    %c0_i32_0 = arith.constant 0 : i32
    %c0_i32_1 = arith.constant 0 : i32
    return %c0_i32, %c0_i32_0 : i32, i32
  }
  func.func @transform_4(%arg0: i32) -> (i32, i32) {
    %c0_i32 = arith.constant 0 : i32
    %c0_i32_0 = arith.constant 0 : i32
    %c0_i32_1 = arith.constant 0 : i32
    return %c0_i32, %c0_i32_0 : i32, i32
  }
  func.func @transform_5(%arg0: i32) -> (i32, i32) {
    %c0_i32 = arith.constant 0 : i32
    %c0_i32_0 = arith.constant 0 : i32
    %c0_i32_1 = arith.constant 0 : i32
    return %c0_i32, %c0_i32_0 : i32, i32
  }
  func.func @transform_6(%arg0: i32) -> (i32, i32) {
    %c0_i32 = arith.constant 0 : i32
    %c0_i32_0 = arith.constant 0 : i32
    %c0_i32_1 = arith.constant 0 : i32
    return %c0_i32, %c0_i32_0 : i32, i32
  }
  func.func @transform_7(%arg0: i32) -> (i32, i32) {
    %c0_i32 = arith.constant 0 : i32
    %c0_i32_0 = arith.constant 0 : i32
    return %c0_i32, %arg0 : i32, i32
  }
}

</mosaic_0001>

<bundles_post_ra>
// kernel: tpu_custom_call.1
= control target key start
LH: loop header
LB: loop body
LE: loop exit
PB: predicated region body
PF: predicated region fallthrough
CT: control target
= control target key end

     0   :  { %s730_s0 = inlined_call_operand.vmem [shape: f32[2,128], index: 0, kind: input, shape index: {}]   ;;  %s731_s1 = inlined_call_operand.vmem [shape: f32[64,2], index: 1, kind: input, shape index: {}]   ;;  %s732_s2 = inlined_call_operand.vmem [shape: f32[64,1], index: 2, kind: input, shape index: {}]   ;;  %s733_s3 = inlined_call_operand.vmem [shape: f32[64,64], index: 3, kind: input, shape index: {}]   ;;  %s734_s4 = inlined_call_operand.vmem [shape: f32[64,1], index: 4, kind: input, shape index: {}]   ;;  %s735_s5 = inlined_call_operand.vmem [shape: f32[64,1], index: 5, kind: input, shape index: {}]   ;;  %s736_s6 = inlined_call_operand.<no memory space> [shape: f32[1,1], index: 6, kind: input, shape index: {}]   ;;  %s737_s7 = inlined_call_operand.hbm [shape: f32[1,128], index: 7, kind: output, shape index: {}]  }
   0x1   :  { %v12_v0 = vstv %s736_s6 }
   0x2   :  { %13 = vst [vmem:[#allocation2] sm:$0x1] %v12_v0 }
   0x3   :  { %v37_v1 = vld [vmem:[%s731_s1 + $0x38] sm:$0xff]  ;;  %v36_v2 = vld [vmem:[%s731_s1 + $0x30] sm:$0xff]  ;;  %v527_v3 = vmov 1   ;;  %v528_v4 = vmov 0  }
   0x4   :  { %461 = vset.pattern.permute.xlu2 %v527_v3  ;;  %460 = vset.pattern.permute.xlu1 %v528_v4 }
   0x5   :  { %459 = vset.pattern.permute.xlu0 %v528_v4  ;;  %172 = vperm.xlu2 %461, %v37_v1  }
   0x6   :  { %83 = vperm.xlu0 %459, %v37_v1   ;;  %78 = vperm.xlu1 %460, %v36_v2  }
   0x7   :  { %14 = vsyncpa [#allocation4], 0  ;;  %v45_v5 = vld [vmem:[%s732_s2 + $0x38] sm:$0xff]  ;;  %v30_v6 = vld [vmem:[%s731_s1] sm:$0xff]  ;;  %vm256_vm0 = vcmask 523264   ;;  %s415_s6 = sshll.u32 %s737_s7, 4  ;;  %s416_s6 = int_to_ptr.hbm [resolvable:$true] %s415_s6 }
   0x8   :  { %v35_v7 = vld [vmem:[%s731_s1 + $0x28] sm:$0xff]  ;;  %v44_v8 = vld [vmem:[%s732_s2 + $0x30] sm:$0xff]  ;;  %v34_v9 = vld [vmem:[%s731_s1 + $0x20] sm:$0xff] }
   0x9   :  { %v43_v10 = vld [vmem:[%s732_s2 + $0x28] sm:$0xff]  ;;  %v33_v11 = vld [vmem:[%s731_s1 + $0x18] sm:$0xff]  ;;  %v42_v12 = vld [vmem:[%s732_s2 + $0x20] sm:$0xff] }
   0xa   :  { %v32_v13 = vld [vmem:[%s731_s1 + $0x10] sm:$0xff]  ;;  %v41_v14 = vld [vmem:[%s732_s2 + $0x18] sm:$0xff]  ;;  %v31_v15 = vld [vmem:[%s731_s1 + $0x8] sm:$0xff] }
   0xb   :  { %v40_v16 = vld [vmem:[%s732_s2 + $0x10] sm:$0xff]  ;;  %v39_v17 = vld [vmem:[%s732_s2 + $0x8] sm:$0xff]  ;;  %v38_v18 = vld [vmem:[%s732_s2] sm:$0xff] }
   0xc   :  { %v208_v19 = vld [vmem:[%s734_s4] sm:$0xff]  ;;  %v211_v20 = vld [vmem:[%s734_s4 + $0x18] sm:$0xff]  ;;  %v213_v21 = vld [vmem:[%s734_s4 + $0x28] sm:$0xff] }
   0xd   :  { %462 = vset.pattern.permute.xlu2 %v528_v4  ;;  %v214_v22 = vld [vmem:[%s734_s4 + $0x30] sm:$0xff]  ;;  %v333_v23 = vld [vmem:[%s735_s5 + $0x18] sm:$0xff]  ;;  %v29_v27 = vld [vmem:[%s730_s0] sm:$0x3] }
   0xe   :  { %132 = vperm.xlu1 %460, %v45_v5   ;;  %48 = vperm.xlu0 %459, %v30_v6   ;;  %v336_v25 = vld [vmem:[%s735_s5 + $0x30] sm:$0xff]  ;;  %v642_v30 = vperm.slane %v29_v27, 0  ;;  %v644_v31 = vperm.slane %v29_v27, 1  ;;  %v209_v48 = vld [vmem:[%s734_s4 + $0x8] sm:$0xff]  ;;  %v212_v59 = vld [vmem:[%s734_s4 + $0x20] sm:$0xff] }
   0xf   :  { %73 = vperm.xlu2 %462, %v35_v7   ;;  %v210_v47 = vld [vmem:[%s734_s4 + $0x10] sm:$0xff]  ;;  %v331_v57 = vld [vmem:[%s735_s5 + $0x8] sm:$0xff] }
  0x16   :  { %463 = vset.pattern.permute.xlu1 %v527_v3  ;;  %127 = vperm.xlu0 %459, %v44_v8  }
  0x17   :  { %168 = vperm.xlu1 %463, %v36_v2   ;;  %68 = vperm.xlu2 %462, %v34_v9  }
  0x1e   :  { %122 = vperm.xlu0 %459, %v43_v10  }
  0x1f   :  { %164 = vperm.xlu1 %463, %v35_v7   ;;  %63 = vperm.xlu2 %462, %v33_v11  }
  0x26   :  { %117 = vperm.xlu0 %459, %v42_v12   ;;  %v335_v12 = vld [vmem:[%s735_s5 + $0x28] sm:$0xff] }
  0x27   :  { %160 = vperm.xlu1 %463, %v34_v9   ;;  %58 = vperm.xlu2 %462, %v32_v13  }
  0x2e   :  { %112 = vperm.xlu0 %459, %v41_v14   ;;  %v332_v14 = vld [vmem:[%s735_s5 + $0x10] sm:$0xff] }
  0x2f   :  { %156 = vperm.xlu1 %463, %v33_v11   ;;  %53 = vperm.xlu2 %462, %v31_v15  }
  0x36   :  { %107 = vperm.xlu0 %459, %v40_v16  }
  0x37   :  { %152 = vperm.xlu1 %463, %v32_v13   ;;  %102 = vperm.xlu2 %462, %v39_v17  }
  0x3e   :  { %464 = vset.pattern.permute.xlu0 %v527_v3 }
  0x3f   :  { %465 = vset.pattern.permute.xlu1 %v528_v4  ;;  %148 = vperm.xlu0 %464, %v31_v15  }
  0x40   :  { %97 = vperm.xlu1 %465, %v38_v18   ;;  %466 = vset.pattern.permute.xlu2 %v527_v3  ;;  %v215_v3 = vld [vmem:[%s734_s4 + $0x38] sm:$0xff] }
  0x41   :  { %144 = vperm.xlu2 %466, %v30_v6   ;;  %v330_v6 = vld [vmem:[%s735_s5] sm:$0xff] }
  0x47   :  { %468 = vset.pattern.permute.xlu0 %v528_v4 }
  0x48   :  { %218 = vperm.xlu1 %465, %v208_v19   ;;  %228 = vperm.xlu0 %468, %v210_v47  }
  0x49   :  { %467 = vset.pattern.permute.xlu2 %v528_v4 }
  0x4a   :  { %223 = vperm.xlu2 %467, %v209_v48  }
  0x50   :  { %233 = vperm.xlu1 %465, %v211_v20   ;;  %345 = vperm.xlu0 %468, %v331_v57  }
  0x52   :  { %238 = vperm.xlu2 %467, %v212_v59  }
  0x58   :  { %243 = vperm.xlu1 %465, %v213_v21   ;;  %253 = vperm.xlu0 %468, %v215_v3  }
  0x5a   :  { %340 = vperm.xlu2 %467, %v330_v6  }
  0x5f   :  { %v173_v24 = vpop.permute.xlu2 %172 }
  0x60   :  { %248 = vperm.xlu1 %465, %v214_v22   ;;  %v183_v36 = vmul.f32 %v644_v31, %v173_v24  ;;  %365 = vperm.xlu0 %468, %v335_v12   ;;  %v399_v22 = vld [vmem:[#allocation2] sm:$0x1] }
  0x61   :  { %v334_v24 = vld [vmem:[%s735_s5 + $0x20] sm:$0xff] }
  0x62   :  { %350 = vperm.xlu2 %467, %v332_v14  }
  0x68   :  { %355 = vperm.xlu1 %465, %v333_v23   ;;  %402 = vperm.xlu0 %468, %v399_v22  }
  0x69   :  { %v74_v26 = vpop.permute.xlu2 %73 }
  0x6a   :  { %v92_v49 = vmul.f32 %v642_v30, %v74_v26  ;;  %360 = vperm.xlu2 %467, %v334_v24  }
  0x70   :  { %370 = vperm.xlu1 %465, %v336_v25  }
  0x71   :  { %v69_v32 = vpop.permute.xlu2 %68 }
  0x72   :  { %v91_v58 = vmul.f32 %v642_v30, %v69_v32 }
  0x78   :  { %v84_v28 = vpop.permute.xlu0 %83  ;;  %v79_v29 = vpop.permute.xlu1 %78 }
  0x79   :  { %v94_v33 = vmul.f32 %v642_v30, %v84_v28  ;;  %v93_v39 = vmul.f32 %v642_v30, %v79_v29  ;;  %v64_v40 = vpop.permute.xlu2 %63 }
  0x7a   :  { %v90_v4 = vmul.f32 %v642_v30, %v64_v40  ;;  %v202_v40 = vld [vmem:[%s733_s3 + $0x10] sm:$0xff] }
  0x80   :  { %v133_v34 = vpop.permute.xlu1 %132  ;;  %v647_v35 = vpop.permute.xlu0 %48 }
  0x81   :  { %v142_v37 = vadd.f32 %v133_v34, %v94_v33  ;;  %v59_v53 = vpop.permute.xlu2 %58  ;;  %v87_v26 = vmul.f32 %v642_v30, %v647_v35 }
  0x82   :  { %v89_v15 = vmul.f32 %v642_v30, %v59_v53 }
  0x83   :  { %v191_v38 = vadd.f32 %v183_v36, %v142_v37 }
  0x85   :  { %469 = vtanh.f32 %v191_v38 }
  0x88   :  { %v128_v41 = vpop.permute.xlu0 %127 }
  0x89   :  { %v141_v42 = vadd.f32 %v128_v41, %v93_v39  ;;  %v169_v43 = vpop.permute.xlu1 %168  ;;  %v54_v1 = vpop.permute.xlu2 %53  ;;  %v204_v41 = vld [vmem:[%s733_s3 + $0x20] sm:$0xff] }
  0x8a   :  { %v182_v44 = vmul.f32 %v644_v31, %v169_v43  ;;  %v88_v25 = vmul.f32 %v642_v30, %v54_v1  ;;  %v337_v30 = vld [vmem:[%s735_s5 + $0x38] sm:$0xff]  ;;  %v201_v43 = vld [vmem:[%s733_s3 + $0x8] sm:$0xff] }
  0x8b   :  { %v470_v45 = vpop.eup %469  ;;  %375 = vperm.xlu2 %467, %v337_v30  }
  0x8c   :  { %v190_v46 = vadd.f32 %v182_v44, %v141_v42  ;;  %289 = vmatpush.msra.mxu0 %v470_v45  ;;  %432 = vmatpush.msra.mxu1 %v470_v45  ;;  %v206_v42 = vld [vmem:[%s733_s3 + $0x30] sm:$0xff]  ;;  %v203_v44 = vld [vmem:[%s733_s3 + $0x18] sm:$0xff] }
  0x8d   :  { %433 = vmatpush.msra.mxu2 %v470_v45  ;;  %434 = vmatpush.msra.mxu3 %v470_v45  ;;  %v205_v45 = vld [vmem:[%s733_s3 + $0x28] sm:$0xff] }
  0x8e   :  { %471 = vtanh.f32 %v190_v46  ;;  %v207_v46 = vld [vmem:[%s733_s3 + $0x38] sm:$0xff] }
  0x90   :  { %v123_v50 = vpop.permute.xlu0 %122 }
  0x91   :  { %v140_v51 = vadd.f32 %v123_v50, %v92_v49  ;;  %v165_v52 = vpop.permute.xlu1 %164  ;;  %v103_v13 = vpop.permute.xlu2 %102 }
  0x92   :  { %v181_v54 = vmul.f32 %v644_v31, %v165_v52  ;;  %v136_v29 = vadd.f32 %v103_v13, %v88_v25 }
  0x94   :  { %v472_v55 = vpop.eup %471  ;;  %v189_v56 = vadd.f32 %v181_v54, %v140_v51 }
  0x95   :  { %290 = vmatpush.msra.mxu0 %v472_v55  ;;  %435 = vmatpush.msra.mxu1 %v472_v55 }
  0x96   :  { %473 = vtanh.f32 %v189_v56  ;;  %436 = vmatpush.msra.mxu2 %v472_v55  ;;  %437 = vmatpush.msra.mxu3 %v472_v55 }
  0x98   :  { %v118_v60 = vpop.permute.xlu0 %117 }
  0x99   :  { %v139_v61 = vadd.f32 %v118_v60, %v91_v58  ;;  %v161_v62 = vpop.permute.xlu1 %160 }
  0x9a   :  { %v180_v63 = vmul.f32 %v644_v31, %v161_v62 }
  0x9b   :  { %v145_v23 = vpop.permute.xlu2 %144 }
  0x9c   :  { %v474_v0 = vpop.eup %473  ;;  %v188_v2 = vadd.f32 %v180_v63, %v139_v61  ;;  %v176_v28 = vmul.f32 %v644_v31, %v145_v23 }
  0x9d   :  { %291 = vmatpush.msra.mxu0 %v474_v0  ;;  %438 = vmatpush.msra.mxu1 %v474_v0 }
  0x9e   :  { %475 = vtanh.f32 %v188_v2  ;;  %439 = vmatpush.msra.mxu2 %v474_v0  ;;  %440 = vmatpush.msra.mxu3 %v474_v0 }
  0xa0   :  { %v113_v5 = vpop.permute.xlu0 %112 }
  0xa1   :  { %v138_v7 = vadd.f32 %v113_v5, %v90_v4  ;;  %v157_v8 = vpop.permute.xlu1 %156 }
  0xa2   :  { %v179_v9 = vmul.f32 %v644_v31, %v157_v8 }
  0xa4   :  { %v476_v10 = vpop.eup %475  ;;  %v187_v11 = vadd.f32 %v179_v9, %v138_v7  ;;  %v224_v48 = vpop.permute.xlu2 %223 }
  0xa5   :  { %292 = vmatpush.msra.mxu0 %v476_v10  ;;  %441 = vmatpush.msra.mxu1 %v476_v10 }
  0xa6   :  { %477 = vtanh.f32 %v187_v11  ;;  %442 = vmatpush.msra.mxu2 %v476_v10  ;;  %443 = vmatpush.msra.mxu3 %v476_v10 }
  0xa8   :  { %v108_v16 = vpop.permute.xlu0 %107 }
  0xa9   :  { %v137_v17 = vadd.f32 %v108_v16, %v89_v15  ;;  %v153_v18 = vpop.permute.xlu1 %152 }
  0xaa   :  { %v178_v19 = vmul.f32 %v644_v31, %v153_v18 }
  0xac   :  { %v478_v20 = vpop.eup %477  ;;  %v186_v21 = vadd.f32 %v178_v19, %v137_v17  ;;  %v239_v50 = vpop.permute.xlu2 %238 }
  0xad   :  { %293 = vmatpush.msra.mxu0 %v478_v20  ;;  %444 = vmatpush.msra.mxu1 %v478_v20 }
  0xae   :  { %479 = vtanh.f32 %v186_v21  ;;  %445 = vmatpush.msra.mxu2 %v478_v20  ;;  %446 = vmatpush.msra.mxu3 %v478_v20 }
  0xb1   :  { %v149_v27 = vpop.permute.xlu0 %148 }
  0xb2   :  { %v177_v32 = vmul.f32 %v644_v31, %v149_v27  ;;  %v98_v33 = vpop.permute.xlu1 %97  ;;  %v200_v31 = vld [vmem:[%s733_s3] sm:$0xff]  ;;  %s529_s3 = smov [#allocation3]  }
  0xb3   :  { %v135_v34 = vadd.f32 %v98_v33, %v87_v26  ;;  %s413_s28 = sshll.u32 %s529_s3, 4  ;;  %s414_s28 = int_to_ptr.vmem [resolvable:$true] %s413_s28 }
  0xb4   :  { %v480_v36 = vpop.eup %479  ;;  %v185_v37 = vadd.f32 %v177_v32, %v136_v29  ;;  %v341_v53 = vpop.permute.xlu2 %340 }
  0xb5   :  { %v184_v38 = vadd.f32 %v176_v28, %v135_v34  ;;  %294 = vmatpush.msra.mxu0 %v480_v36  ;;  %447 = vmatpush.msra.mxu1 %v480_v36 }
  0xb6   :  { %481 = vtanh.f32 %v185_v37  ;;  %448 = vmatpush.msra.mxu2 %v480_v36  ;;  %449 = vmatpush.msra.mxu3 %v480_v36 }
  0xb7   :  { %483 = vtanh.f32 %v184_v38 }
  0xba   :  { %v219_v47 = vpop.permute.xlu1 %218  ;;  %v229_v52 = vpop.permute.xlu0 %228 }
  0xbc   :  { %v482_v35 = vpop.eup %481  ;;  %v351_v1 = vpop.permute.xlu2 %350 }
  0xbd   :  { %v484_v39 = vpop.eup %483  ;;  %295 = vmatpush.msra.mxu0 %v482_v35  ;;  %450 = vmatpush.msra.mxu1 %v482_v35 }
  0xbe   :  { %451 = vmatpush.msra.mxu2 %v482_v35  ;;  %452 = vmatpush.msra.mxu3 %v482_v35 }
  0xbf   :  { %296 = vmatpush.msra.mxu0 %v484_v39  ;;  %453 = vmatpush.msra.mxu1 %v484_v39 }
  0xc0   :  { %454 = vmatpush.msra.mxu2 %v484_v39  ;;  %455 = vmatpush.msra.mxu3 %v484_v39 }
  0xc1   :  { %424 = vmatmul.msk.f32.vlgmr.msra.gmra.mxu0 %vm256_vm0, %v200_v31  ;;  %426 = vmatmul.msk.f32.vlgmr.msra.gmra.mxu1 %vm256_vm0, %v202_v40 }
  0xc2   :  { %428 = vmatmul.msk.f32.vlgmr.msra.gmra.mxu2 %vm256_vm0, %v204_v41  ;;  %430 = vmatmul.msk.f32.vlgmr.msra.gmra.mxu3 %vm256_vm0, %v206_v42  ;;  %v234_v49 = vpop.permute.xlu1 %233  ;;  %v346_v57 = vpop.permute.xlu0 %345 }
  0xc4   :  { %v361_v17 = vpop.permute.xlu2 %360 }
  0xc9   :  { %425 = vmatmul.msk.f32.gmra.mxu0 %vm256_vm0, %v201_v43  ;;  %427 = vmatmul.msk.f32.gmra.mxu1 %vm256_vm0, %v203_v44 }
  0xca   :  { %429 = vmatmul.msk.f32.gmra.mxu2 %vm256_vm0, %v205_v45  ;;  %431 = vmatmul.msk.f32.gmra.mxu3 %vm256_vm0, %v207_v46  ;;  %v244_v51 = vpop.permute.xlu1 %243  ;;  %v254_v7 = vpop.permute.xlu0 %253 }
  0xd2   :  { %v249_v56 = vpop.permute.xlu1 %248  ;;  %v366_v27 = vpop.permute.xlu0 %365 }
  0xda   :  { %v356_v12 = vpop.permute.xlu1 %355  ;;  %v403_v42 = vpop.permute.xlu0 %402 }
  0xdb   :  { %v405_v44 = vperm.slane %v403_v42, 0 }
  0xe2   :  { %v371_v33 = vpop.permute.xlu1 %370 }
  0xe5   :  { %v376_v37 = vpop.permute.xlu2 %375 }
 0x13e   :  { %v298_v54 = vpop.f32.mrf.mxu0  ;;  %v304_v55 = vpop.f32.mrf.mxu1 }
 0x13f   :  { %v299_v58 = vadd.f32 %v298_v54, %v219_v47  ;;  %v305_v59 = vadd.f32 %v304_v55, %v229_v52 }
 0x141   :  { %485 = vtanh.f32 %v299_v58 }
 0x142   :  { %487 = vtanh.f32 %v305_v59 }
 0x145   :  { %v310_v60 = vpop.f32.mrf.mxu2  ;;  %v316_v61 = vpop.f32.mrf.mxu3 }
 0x146   :  { %v301_v62 = vpop.f32.mrf.mxu0  ;;  %v307_v63 = vpop.f32.mrf.mxu1  ;;  %v311_v3 = vadd.f32 %v310_v60, %v239_v50  ;;  %v317_v8 = vadd.f32 %v316_v61, %v249_v56 }
 0x147   :  { %v302_v0 = vadd.f32 %v301_v62, %v224_v48  ;;  %v308_v2 = vadd.f32 %v307_v63, %v234_v49  ;;  %v486_v6 = vpop.eup %485 }
 0x148   :  { %v488_v10 = vpop.eup %487  ;;  %v378_v14 = vmul.f32 %v486_v6, %v341_v53 }
 0x149   :  { %489 = vtanh.f32 %v302_v0  ;;  %v380_v18 = vmul.f32 %v488_v10, %v351_v1 }
 0x14a   :  { %491 = vtanh.f32 %v308_v2 }
 0x14b   :  { %493 = vtanh.f32 %v311_v3 }
 0x14d   :  { %v313_v4 = vpop.f32.mrf.mxu2  ;;  %v319_v5 = vpop.f32.mrf.mxu3 }
 0x14e   :  { %v314_v9 = vadd.f32 %v313_v4, %v244_v51  ;;  %v320_v13 = vadd.f32 %v319_v5, %v254_v7 }
 0x14f   :  { %v490_v11 = vpop.eup %489 }
 0x150   :  { %495 = vtanh.f32 %v314_v9  ;;  %v379_v15 = vmul.f32 %v490_v11, %v346_v57  ;;  %v492_v16 = vpop.eup %491 }
 0x151   :  { %497 = vtanh.f32 %v317_v8  ;;  %v494_v20 = vpop.eup %493  ;;  %v381_v21 = vmul.f32 %v492_v16, %v356_v12 }
 0x152   :  { %v386_v19 = vadd.f32 %v379_v15, %v378_v14  ;;  %499 = vtanh.f32 %v320_v13  ;;  %v382_v24 = vmul.f32 %v494_v20, %v361_v17 }
 0x154   :  { %v387_v22 = vadd.f32 %v386_v19, %v380_v18 }
 0x156   :  { %v496_v23 = vpop.eup %495  ;;  %v388_v25 = vadd.f32 %v387_v22, %v381_v21 }
 0x157   :  { %v498_v26 = vpop.eup %497  ;;  %v383_v28 = vmul.f32 %v496_v23, %v366_v27 }
 0x158   :  { %v389_v29 = vadd.f32 %v388_v25, %v382_v24  ;;  %v500_v32 = vpop.eup %499  ;;  %v384_v34 = vmul.f32 %v498_v26, %v371_v33 }
 0x159   :  { %v385_v38 = vmul.f32 %v500_v32, %v376_v37 }
 0x15a   :  { %v390_v36 = vadd.f32 %v389_v29, %v383_v28 }
 0x15c   :  { %v391_v30 = vadd.f32 %v390_v36, %v384_v34 }
 0x15e   :  { %v392_v35 = vadd.f32 %v391_v30, %v385_v38 }
 0x160   :  { %v393_v39 = vrot.slane %v392_v35, 4 }
 0x162   :  { %v394_v31 = vadd.f32 %v393_v39, %v392_v35 }
 0x164   :  { %v395_v40 = vrot.slane %v394_v31, 2 }
 0x166   :  { %v396_v41 = vadd.f32 %v395_v40, %v394_v31 }
 0x168   :  { %v397_v43 = vrot.slane %v396_v41, 1 }
 0x16a   :  { %v398_v45 = vadd.f32 %v397_v43, %v396_v41 }
 0x16c   :  { %v406_v46 = vadd.f32 %v405_v44, %v398_v45 }
 0x16e   :  { %407 = vst [vmem:[#allocation3] sm:$0x1] %v406_v46 }
 0x16f   :  { %418 = dma.vmem_to_hbm [thread:$0]  %s414_s28, 16, %s416_s6, [#allocation4]  }
 0x170   :  { %525 = dma.done.wait [#allocation4], 16  }
 0x171   :  { %526 = vsyncadd [#allocation4], 4294967280 }
 0x172   :  { %423 = vsyncpa [#allocation4], 1 }

</bundles_post_ra>
